<compile_context>
chip_gen: v7x
topology: tpu7x:2x2x1
jax: 0.10.0
libtpu: 0.0.40
codegen_flags: <defaults>
</compile_context>

<pallas_src>
import jax
import jax.numpy as jnp
from jax.experimental import pallas as pl
from jax.experimental.pallas import tpu as pltpu


def _round_up(x, m):
    return ((x + m - 1) // m) * m


def _cdiv(a, b):
    return (a + b - 1) // b


# ---------------------------------------------------------------------------
# Pallas kernel: fused Linear + bias + ReLU
# ---------------------------------------------------------------------------

def worker_stats_kernel(x_ref, w_ref, b_ref, o_ref):
    # x: (tm, K), w: (K, N_pad), b: (1, N_pad) -> o: (tm, N_pad)
    y = jnp.dot(x_ref[...], w_ref[...], preferred_element_type=jnp.float32)
    o_ref[...] = jnp.maximum(y + b_ref[...], 0.0).astype(o_ref.dtype)


# ---------------------------------------------------------------------------
# Wrapper
# ---------------------------------------------------------------------------

def worker_stats_encoder(stats, w, b, *, block_rows=4096, out_dtype=jnp.float32):
    """relu(stats @ w + b) via a single pallas_call.

    stats: (M, stats_dim) f32
    w:     (stats_dim, hist_dim) f32   (transposed vs. PyTorch's (out, in) weight)
    b:     (hist_dim,) f32
    """
    M, K = stats.shape
    N = w.shape[1]

    # Lane-dense output: pad hist_dim to a multiple of 128 (no-op for the default
    # hist_dim=128).  Padded weight columns are zero -> relu(0+0)=0, sliced off.
    N_pad = _round_up(N, 128)
    w_p = w if N_pad == N else jnp.pad(w, ((0, 0), (0, N_pad - N)))
    b_p = (b if N_pad == N else jnp.pad(b, (0, N_pad - N))).reshape(1, N_pad)

    out_bytes = jnp.dtype(out_dtype).itemsize
    cost = pl.CostEstimate(
        flops=2 * M * K * N_pad,
        transcendentals=0,
        bytes_accessed=4 * (M * K + K * N_pad + N_pad) + out_bytes * M * N_pad,
    )

    # Keep the row tile large enough to amortize the ~0.35us per-grid-step cost.
    block_rows = max(int(block_rows), 512)

    if M <= block_rows:
        # Small batch: whole problem in VMEM, single invocation, grid=().
        # Full-array blocks are exempt from the (8,128) rule -> no M padding.
        out = pl.pallas_call(
            worker_stats_kernel,
            in_specs=[
                pl.BlockSpec(memory_space=pltpu.MemorySpace.VMEM),
                pl.BlockSpec(memory_space=pltpu.MemorySpace.VMEM),
                pl.BlockSpec(memory_space=pltpu.MemorySpace.VMEM),
            ],
            out_specs=pl.BlockSpec(memory_space=pltpu.MemorySpace.VMEM),
            out_shape=jax.ShapeDtypeStruct((M, N_pad), out_dtype),
            cost_estimate=cost,
        )(stats, w_p, b_p)
    else:
        # Large batch: tile rows on a "parallel" grid axis.  Cap tm at cdiv(M, 2)
        # so num_tiles >= 2 (keeps both v7x TensorCores busy); weight/bias blocks
        # are constant -> stay resident in VMEM across all row tiles.  The last
        # row block may be ragged; Pallas masks its out-of-bounds stores.
        tm = _round_up(min(block_rows, _cdiv(M, 2)), 8)
        num_tiles = _cdiv(M, tm)
        out = pl.pallas_call(
            worker_stats_kernel,
            grid=(num_tiles,),
            in_specs=[
                pl.BlockSpec((tm, K), lambda i: (i, 0)),
                pl.BlockSpec((K, N_pad), lambda i: (0, 0)),
                pl.BlockSpec((1, N_pad), lambda i: (0, 0)),
            ],
            out_specs=pl.BlockSpec((tm, N_pad), lambda i: (i, 0)),
            out_shape=jax.ShapeDtypeStruct((M, N_pad), out_dtype),
            compiler_params=pltpu.CompilerParams(
                dimension_semantics=("parallel",)),
            cost_estimate=cost,
        )(stats, w_p, b_p)

    return out if N_pad == N else out[:, :N]


# ---------------------------------------------------------------------------
# Param init (matches PyTorch nn.Linear default init, weight stored transposed)
# ---------------------------------------------------------------------------

def init_params(key, stats_dim, hist_dim):
    kw, kb = jax.random.split(key)
    bound = 1.0 / jnp.sqrt(jnp.float32(stats_dim))
    w = jax.random.uniform(kw, (stats_dim, hist_dim), jnp.float32, -bound, bound)
    b = jax.random.uniform(kb, (hist_dim,), jnp.float32, -bound, bound)
    return {"fc_w": w, "fc_b": b}


def worker_stats_encoder_forward(params, stats, *, block_rows=4096,
                                 out_dtype=jnp.float32):
    return worker_stats_encoder(stats, params["fc_w"], params["fc_b"],
                                block_rows=block_rows, out_dtype=out_dtype)


# ---------------------------------------------------------------------------
# main
# ---------------------------------------------------------------------------

if __name__ == "__main__":
    key = jax.random.PRNGKey(0)
    k_p, k_x1, k_x2 = jax.random.split(key, 3)

    stats_dim, hist_dim = 32, 128
    params = init_params(k_p, stats_dim, hist_dim)

    def reference(p, x):
        return jnp.maximum(x @ p["fc_w"] + p["fc_b"], 0.0)

    # --- small batch (grid=() path, no padding / slicing) -------------------
    B = 2
    stats = jax.random.normal(k_x1, (B, stats_dim), jnp.float32)
    fwd = jax.jit(worker_stats_encoder_forward)
    out = fwd(params, stats)
    jax.block_until_ready(out)

    assert out.shape == (B, hist_dim)
    assert out.dtype == jnp.float32
    assert jnp.allclose(out, reference(params, stats), atol=1e-5, rtol=1e-5)
    assert jnp.all(out >= 0.0)

    # --- larger batch (row-tiled parallel-grid path, ragged last block) -----
    B2 = 1200  # with block_rows=512: tm=512, grid=(3,), ragged last block of 176 rows
    stats2 = jax.random.normal(k_x2, (B2, stats_dim), jnp.float32)
    fwd_tiled = jax.jit(
        lambda p, x: worker_stats_encoder_forward(p, x, block_rows=512))
    out2 = fwd_tiled(params, stats2)
    jax.block_until_ready(out2)

    assert out2.shape == (B2, hist_dim)
    assert jnp.allclose(out2, reference(params, stats2), atol=1e-5, rtol=1e-5)

    # --- optional bf16 output path (halves the dominant HBM output stream) --
    out_bf16 = jax.jit(
        lambda p, x: worker_stats_encoder_forward(p, x, out_dtype=jnp.bfloat16)
    )(params, stats)
    jax.block_until_ready(out_bf16)
    assert out_bf16.dtype == jnp.bfloat16
    assert jnp.allclose(out_bf16.astype(jnp.float32), reference(params, stats),
                        atol=2e-2, rtol=2e-2)

    print("KERNEL_OK")
</pallas_src>

<mosaic_0001>
module attributes {stable_mosaic.version = 11 : i64} {
  func.func @worker_stats_kernel(%arg0: memref<2x32xf32, #tpu.memory_space<vmem>>, %arg1: memref<32x128xf32, #tpu.memory_space<vmem>>, %arg2: memref<1x128xf32, #tpu.memory_space<vmem>>, %arg3: memref<2x128xf32, #tpu.memory_space<vmem>>) attributes {dimension_semantics = [], scalar_prefetch = 0 : i64, scratch_operands = 0 : i64, tpu.core_type = #tpu.core_type<tc>} {
    %c0 = arith.constant 0 : index
    %c0_0 = arith.constant 0 : index
    %0 = vector.load %arg0[%c0, %c0_0] : memref<2x32xf32, #tpu.memory_space<vmem>>, vector<2x32xf32>
    %c0_1 = arith.constant 0 : index
    %c0_2 = arith.constant 0 : index
    %1 = vector.load %arg1[%c0_1, %c0_2] : memref<32x128xf32, #tpu.memory_space<vmem>>, vector<32x128xf32>
    %cst = arith.constant dense<0.000000e+00> : vector<2x128xf32>
    %2 = tpu.matmul %0, %1, %cst {dimension_numbers = #tpu.dot_dimension_numbers<[1], [0], [0], [1], [0, 0, 1, 1], [], []>} : vector<2x32xf32>, vector<32x128xf32>, vector<2x128xf32> -> vector<2x128xf32>
    %c0_3 = arith.constant 0 : index
    %c0_4 = arith.constant 0 : index
    %3 = vector.load %arg2[%c0_3, %c0_4] : memref<1x128xf32, #tpu.memory_space<vmem>>, vector<1x128xf32>
    %4 = vector.broadcast %3 : vector<1x128xf32> to vector<2x128xf32>
    %5 = arith.addf %2, %4 : vector<2x128xf32>
    %cst_5 = arith.constant 0.000000e+00 : f32
    %6 = vector.broadcast %cst_5 : f32 to vector<2x128xf32>
    %7 = arith.maximumf %5, %6 : vector<2x128xf32>
    %c0_6 = arith.constant 0 : index
    %c0_7 = arith.constant 0 : index
    %8 = vector.load %arg3[%c0_6, %c0_7] : memref<2x128xf32, #tpu.memory_space<vmem>>, vector<2x128xf32>
    tpu.vector_store %arg3[%c0_6, %c0_7], %7 {strides = array<i32>} : memref<2x128xf32, #tpu.memory_space<vmem>>, vector<2x128xf32>,
    return
  }
}

</mosaic_0001>

<bundles_post_ra>
// kernel: worker_stats_encoder_forward.1
= control target key start
LH: loop header
LB: loop body
LE: loop exit
PB: predicated region body
PF: predicated region fallthrough
CT: control target
= control target key end

     0   :  { %8 = vsyncpa [#allocation3], 0  ;;  %s268_s0 = inlined_call_operand.vmem [shape: f32[2,32], index: 0, kind: input, shape index: {}]   ;;  %s269_s1 = inlined_call_operand.hbm [shape: f32[32,128], index: 1, kind: input, shape index: {}]   ;;  %s270_s2 = inlined_call_operand.vmem [shape: f32[1,128], index: 2, kind: input, shape index: {}]   ;;  %s271_s3 = inlined_call_operand.hbm [shape: f32[2,128], index: 3, kind: output, shape index: {}]  }
   0x1   :  { %9 = vsyncpa [#allocation4], 0  ;;  %s211_s12 = smov [#allocation2]   ;;  %s163_s16 = scalar_lea.hbm %s269_s1, 512 }
   0x2   :  { %s17_s13 = sshll.u32 %s211_s12, 4  ;;  %p164_p0 = scmp.ne.s32.totalorder %s269_s1, %s163_s16  ;;  %s18_s13 = int_to_ptr.vmem [resolvable:$true] %s17_s13 }
   0x3   :  { %p167_p1 = scmp.lt.u32.totalorder %s163_s16, %s269_s1 }
   0x5   :  { %p169_p2 = pnand %p167_p1, %p164_p0 }
   0x7   :  { %172 = shalt.err (!%p169_p2)
}
   0x8   :  { %s173_s21 = scalar_lea.vmem %s18_s13, 512  ;;  %p178_p4 = scmp.lt.s32.totalorder %s18_s13, %s18_s13 }
   0x9   :  { %p174_p3 = scmp.ne.s32.totalorder %s18_s13, %s173_s21  ;;  %p179_p5 = scmp.lt.s32.totalorder %s173_s21, %s173_s21 }
   0xb   :  { %p180_p6 = por %p179_p5, %p178_p4 }
   0xd   :  { %p181_p7 = pnand %p180_p6, %p174_p3 }
   0xf   :  { %184 = shalt.err (!%p181_p7)
}
  0x10   :  { %s212_s22 = smov 128   ;;  %s213_s23 = smov 8  }
  0x11   :  { %23 = dma.hbm_to_vmem [thread:$0]  %s269_s1, 512, %s18_s13, [#allocation3], %s212_s22, %s212_s22, %s213_s23  }
  0x12   :  { %207 = dma.done.wait [#allocation3], 512  }
  0x13   :  { %208 = vsyncadd [#allocation3], 4294966784  ;;  %v214_v0 = vmov 0.0|0.0   ;;  %vm215_vm0 = vmmov 0   ;;  %v216_v1 = vmov 0.0   ;;  %v30_v2 = vld [vmem:[#allocation2] sm:$0xff] }
  0x14   :  { %150 = vmatprep.subr.bf16.mxu0 %v214_v0  ;;  %147 = vmatprep.mubr.msk.f32.mxu0 %vm215_vm0, %v216_v1  ;;  %v31_v3 = vld [vmem:[#allocation2 + $0x8] sm:$0xff]  ;;  %v32_v4 = vld [vmem:[#allocation2 + $0x10] sm:$0xff]  ;;  %v33_v6 = vld [vmem:[#allocation2 + $0x18] sm:$0xff]  ;;  %vm41_vm1 = vcmask 261120   ;;  %s217_s29 = smov [#allocation5]  }
  0x15   :  { %v151_v5 = vpack.c.bf16 %v31_v3, %v30_v2  ;;  %v154_v7 = vpack.c.bf16 %v33_v6, %v32_v4  ;;  %v29_v8 = vld [vmem:[%s268_s0] sm:$0x3]  ;;  %s123_s30 = sshll.u32 %s217_s29, 4  ;;  %s124_s30 = int_to_ptr.vmem [resolvable:$true] %s123_s30 }
  0x16   :  { %v132_v9 = vld [vmem:[%s270_s2] ss:$0 sm:$0xff]  ;;  %s185_s4 = scalar_lea.vmem %s124_s30, 32  ;;  %p190_p9 = scmp.lt.s32.totalorder %s124_s30, %s124_s30 }
  0x17   :  { %152 = vmatpush3.bf16.msra.mxu0 %v151_v5  ;;  %p186_p8 = scmp.ne.s32.totalorder %s124_s30, %s185_s4  ;;  %p191_p10 = scmp.lt.s32.totalorder %s185_s4, %s185_s4 }
  0x18   :  { %153 = vmatprep.subr.bf16.mxu0 %v214_v0 }
  0x19   :  { %p192_p11 = por %p191_p10, %p190_p9 }
  0x1b   :  { %155 = vmatpush3.bf16.msra.mxu0 %v154_v7  ;;  %p193_p12 = pnand %p192_p11, %p186_p8 }
  0x1e   :  { %148 = vmatmul.mubr.msk.f32.vlgmr.msra.gmra.mrb[0].mxu0 %vm41_vm1, %v29_v8 }
  0xf1   :  { %v111_v10 = vpop.f32.mrb[0].mxu0 }
  0xf2   :  { %v112_v11 = vadd.f32 %v132_v9, %v111_v10  ;;  %v149_v12 = vpop.f32.mrb[1].mxu0 }
  0xf4   :  { %v115_v13 = vmax.f32 %v112_v11, 0.0 }
  0xf6   :  { %116 = vst [vmem:[#allocation5] sm:$0x3] %v115_v13 }
  0xf7   :  { %196 = shalt.err (!%p193_p12)
}
  0xf8   :  { %s197_s6 = scalar_lea.hbm %s271_s3, 32 }
  0xf9   :  { %p198_p13 = scmp.ne.s32.totalorder %s271_s3, %s197_s6  ;;  %p201_p0 = scmp.lt.u32.totalorder %s197_s6, %s271_s3 }
  0xfb   :  { %p203_p1 = pnand %p201_p0, %p198_p13 }
  0xfd   :  { %206 = shalt.err (!%p203_p1)
}
  0xfe   :  { %126 = dma.vmem_to_hbm [thread:$0]  %s124_s30, 32, %s271_s3, [#allocation4]  }
  0xff   :  { %209 = dma.done.wait [#allocation4], 32  }
 0x100   :  { %210 = vsyncadd [#allocation4], 4294967264 }
 0x101   :  { %130 = vsyncpa [#allocation3], 1 }
 0x102   :  { %131 = vsyncpa [#allocation4], 1 }

</bundles_post_ra>
